<compile_context>
chip_gen: v7x
topology: tpu7x:2x2x1
jax: 0.10.0
libtpu: 0.0.40
codegen_flags: <defaults>
</compile_context>

<pallas_src>
import functools

import jax
import jax.numpy as jnp
from jax.experimental import pallas as pl
from jax.experimental.pallas import tpu as pltpu


_TARGET_LANES = 512  # lane-dense tile target (multiple of 128; 512-2048 sweet spot)


def _cdiv(a, b):
    return -(-a // b)


def _block_kernel(x_ref, w_ref, o_ref, *, L):
    """One grid step.

    x_ref: (Bb, Cp, T)   compute dtype; the lane axis holds length-L segments
                         (folded batch elements and/or zero lane-padding).
    w_ref: (2, 3*Cp, Cp) packed weights, W[layer][k*Cp + o, i] = w_layer[i, o, k]
    o_ref: (Bb, Cp, T)   float32
    """
    Bb, Cp, T = x_ref.shape
    acc = jnp.float32

    # Boundary masks, hoisted and pre-broadcast to (Cp, T) once, shared by both layers.
    # A +1/-1 lane shift must not leak across a length-L segment boundary
    # (ConvTranspose1d zero padding) nor wrap around the lane padding / tile edge.
    pos = jax.lax.broadcasted_iota(jnp.int32, (Cp, T), 1) % L
    next_m = (pos != (L - 1)).astype(acc)   # tap that reads v[:, t + 1]
    prev_m = (pos != 0).astype(acc)         # tap that reads v[:, t - 1]

    w1 = w_ref[0]                            # (3Cp, Cp)
    w2 = w_ref[1]

    def conv_t(v, w):
        # Output-side taps: one (3Cp, Cp) @ (Cp, T) MXU matmul (f32 accumulation), then
        # lane-rolls of the three (Cp, T) result bands (XLU) + masked adds (VPU).
        y = jnp.dot(w, v, preferred_element_type=acc)              # (3Cp, T) f32
        out = y[Cp:2 * Cp]                                         # center tap
        out = out + pltpu.roll(y[:Cp], T - 1, axis=1) * next_m     # y0[:, t + 1]
        out = out + pltpu.roll(y[2 * Cp:], 1, axis=1) * prev_m     # y2[:, t - 1]
        return out

    for b in range(Bb):                      # static unroll; Bb is small (<= ~4)
        v = x_ref[b]                         # (Cp, T) compute dtype
        h = jnp.maximum(conv_t(v, w1), 0.0)                   # conv1 + relu1 (f32)
        h = jnp.maximum(conv_t(h.astype(v.dtype), w2), 0.0)   # conv2 + relu2 (f32)
        out = jnp.maximum(h + v.astype(acc), 0.0)             # + identity, final relu
        o_ref[b] = out.astype(o_ref.dtype)


def _pack_w(w, C, Cp):
    # ConvTranspose1d weight (C_in, C_out, 3) -> (3*Cp, Cp), W[k*Cp + o, i] = w[i, o, k].
    wp = jnp.pad(w, ((0, Cp - C), (0, Cp - C), (0, 0)))             # (Cp, Cp, 3)
    return jnp.concatenate([wp[:, :, k].T for k in range(3)], axis=0)  # (3Cp, Cp)


def transpose_residual_block(x, w1, w2, *, compute_dtype=jnp.float32):
    """x: (B, C, L) float32.  w1, w2: (C_in, C_out, 3) ConvTranspose1d weights (PyTorch layout)."""
    B, C, L = x.shape
    out_dtype = x.dtype
    itemsize = jnp.dtype(compute_dtype).itemsize

    # Channel padding to the sublane packing of the compute dtype (8 f32 / 16 bf16);
    # for large C also round toward a multiple of 128 so the 3 weight bands stay tile-aligned.
    pack = 32 // itemsize
    Cp = _cdiv(C, pack) * pack
    if Cp >= 256:
        Cp = _cdiv(Cp, 128) * 128

    fold_layout = L < 128
    if fold_layout:
        # Fold `fold` batch elements into the lane axis so tiles are lane-dense (~512 lanes).
        fold = min(B, max(1, _cdiv(_TARGET_LANES, L)))
        G = _cdiv(B, fold)
        # Optional 2-way split so v7x's two TensorCores both get work -- only when each
        # half stays lane-dense (>= 256 lanes) and has >= 1 MiB of per-step activations.
        if G == 1 and fold >= 2:
            half = _cdiv(fold, 2)
            if half * L >= 256 and half * L * Cp * itemsize >= (1 << 20):
                fold, G = half, _cdiv(B, half)
        Bpad = G * fold
        T = fold * L
        Tpad = _cdiv(T, 128) * 128          # unmasked (lane-dense) stores, aligned rolls
        xg = jnp.pad(x, ((0, Bpad - B), (0, Cp - C), (0, 0)))
        xg = xg.reshape(G, fold, Cp, L).transpose(0, 2, 1, 3).reshape(G, Cp, T)
        xg = jnp.pad(xg, ((0, 0), (0, 0), (0, Tpad - T))).astype(compute_dtype)
        bt0, Tlane = 1, Tpad
    else:
        # L is already lane-dense: skip the batch-folding transpose plumbing entirely
        # (it would cost an extra full HBM round trip of x and of out).
        bt0 = min(B, max(1, _TARGET_LANES // L))
        G = _cdiv(B, bt0)
        Bpad = G * bt0
        Tlane = _cdiv(L, 128) * 128
        xg = jnp.pad(x, ((0, Bpad - B), (0, Cp - C), (0, Tlane - L))).astype(compute_dtype)

    # Pack weights for output-side taps: one (3Cp, Cp) matmul per layer.
    w_mat = jnp.stack([_pack_w(w1, C, Cp), _pack_w(w2, C, Cp)], axis=0).astype(compute_dtype)
    w_bytes = w_mat.size * itemsize

    # Grid-invariant weights: single-buffer them once they are big enough that
    # double-buffering would meaningfully eat VMEM (matters at large Cp on v7x's 64 MiB).
    if w_bytes >= (2 << 20):
        w_spec = pl.BlockSpec((2, 3 * Cp, Cp), lambda g: (0, 0, 0),
                              pipeline_mode=pl.Buffered(1))
    else:
        w_spec = pl.BlockSpec((2, 3 * Cp, Cp), lambda g: (0, 0, 0))

    # Explicit VMEM budget: double-buffered x/out blocks + weights + in-kernel
    # (3Cp,T)/(Cp,T) f32 temporaries, with 2x margin, capped to fit v7x's 64 MiB.
    blk_x = bt0 * Cp * Tlane * itemsize
    blk_o = bt0 * Cp * Tlane * 4
    tmps = (3 + 6) * Cp * Tlane * 4
    vmem_est = 2 * blk_x + 2 * blk_o + 2 * w_bytes + tmps
    vmem_limit = int(min(64 * 1024 * 1024, max(2 * vmem_est, 16 * 1024 * 1024)))
    # TODO(synk): for very large Cp * Tlane (single tile > VMEM), add an L-tiling grid
    # axis with a +/-1 column halo instead of shrinking Cp or the batch fold.

    kernel = functools.partial(_block_kernel, L=L)
    out = pl.pallas_call(
        kernel,
        out_shape=jax.ShapeDtypeStruct(xg.shape, jnp.float32),
        grid_spec=pltpu.PrefetchScalarGridSpec(
            num_scalar_prefetch=0,
            grid=(G,),
            in_specs=[
                pl.BlockSpec((bt0, Cp, Tlane), lambda g: (g, 0, 0)),
                w_spec,
            ],
            out_specs=pl.BlockSpec((bt0, Cp, Tlane), lambda g: (g, 0, 0)),
        ),
        compiler_params=pltpu.CompilerParams(
            dimension_semantics=("parallel",),
            vmem_limit_bytes=vmem_limit,
        ),
    )(xg, w_mat)

    # Undo the layout plumbing and drop batch / channel / lane padding.
    if fold_layout:
        out = out[:, :, :T].reshape(G, Cp, fold, L).transpose(0, 2, 1, 3)
        out = out.reshape(Bpad, Cp, L)[:B, :C, :]
    else:
        out = out[:B, :C, :L]
    return out.astype(out_dtype)


def _reference(x, w1, w2):
    """Pure-JAX reference mirroring PyTorch ConvTranspose1d(k=3, stride=1, pad=1) semantics."""
    B, C, L = x.shape
    hi = jax.lax.Precision.HIGHEST

    def convT(inp, w):
        xp = jnp.pad(inp, ((0, 0), (0, 0), (1, 1)))
        out = jnp.zeros((B, C, L), jnp.float32)
        for k in range(3):
            # contribution: w[i, o, k] * x[b, i, t + 1 - k]
            out = out + jnp.einsum("io,bit->bot", w[:, :, k],
                                   xp[:, :, 2 - k:2 - k + L], precision=hi)
        return out

    h = jax.nn.relu(convT(x, w1))
    h = jax.nn.relu(convT(h, w2))
    return jax.nn.relu(h + x)


if __name__ == "__main__":
    B, C, L = 2, 4, 16
    key = jax.random.PRNGKey(0)
    kx, k1, k2, kx2, kx3 = jax.random.split(key, 5)

    x = jax.random.normal(kx, (B, C, L), dtype=jnp.float32)
    # ConvTranspose1d weight shape: (in_channels, out_channels, kernel_size)
    w1 = jax.random.normal(k1, (C, C, 3), dtype=jnp.float32) * 0.2
    w2 = jax.random.normal(k2, (C, C, 3), dtype=jnp.float32) * 0.2

    # f32 path (batch folded into lanes). Tolerance covers MXU f32 emulation differences.
    out = jax.block_until_ready(transpose_residual_block(x, w1, w2))
    ref = _reference(x, w1, w2)
    assert out.shape == (B, C, L)
    assert jnp.allclose(out, ref, atol=2e-3, rtol=2e-3), "f32 mismatch vs reference"

    # Batch that exercises multi-batch-per-tile folding and lane padding (T=80 -> 128).
    x2 = jax.random.normal(kx2, (5, C, L), dtype=jnp.float32)
    out2 = jax.block_until_ready(transpose_residual_block(x2, w1, w2))
    ref2 = _reference(x2, w1, w2)
    assert jnp.allclose(out2, ref2, atol=2e-3, rtol=2e-3), "multi-batch mismatch vs reference"

    # L >= 128 path: no batch-folding transpose, batch-tiled blocks, 2-step grid, batch pad.
    x3 = jax.random.normal(kx3, (5, C, 128), dtype=jnp.float32)
    out3 = jax.block_until_ready(transpose_residual_block(x3, w1, w2))
    ref3 = _reference(x3, w1, w2)
    assert jnp.allclose(out3, ref3, atol=2e-3, rtol=2e-3), "L>=128 path mismatch vs reference"

    # bf16 MXU-input path (f32 accumulation; loose tolerance for bf16 quantization).
    out_bf16 = jax.block_until_ready(
        transpose_residual_block(x, w1, w2, compute_dtype=jnp.bfloat16))
    assert jnp.allclose(out_bf16, ref, atol=2e-1, rtol=5e-2), "bf16 mismatch vs reference"

    print("KERNEL_OK")
</pallas_src>

<mosaic_0001>
module attributes {stable_mosaic.version = 11 : i64} {
  func.func @_block_kernel(%arg0: i32, %arg1: memref<1x8x128xf32, #tpu.memory_space<vmem>>, %arg2: memref<2x24x8xf32, #tpu.memory_space<vmem>>, %arg3: memref<1x8x128xf32, #tpu.memory_space<vmem>>) attributes {dimension_semantics = [#tpu.dimension_semantics<parallel>], iteration_bounds = array<i64: 1>, scalar_prefetch = 0 : i64, scratch_operands = 0 : i64, tpu.core_type = #tpu.core_type<tc>, window_params = [{transform_indices = @transform_0, window_bounds = array<i64: 1, 8, 128>}, {pipeline_mode = #tpu.pipeline_mode<synchronous>, transform_indices = @transform_1, window_bounds = array<i64: 2, 24, 8>}, {transform_indices = @transform_2, window_bounds = array<i64: 1, 8, 128>}]} {
    %0 = tpu.iota {dimensions = array<i32: 1>} : vector<8x128xi32>
    %c16_i32 = arith.constant 16 : i32
    %c0_i32 = arith.constant 0 : i32
    %1 = arith.cmpi eq, %c16_i32, %c0_i32 : i32
    %c1_i32 = arith.constant 1 : i32
    %2 = arith.select %1, %c1_i32, %c16_i32 : i32
    %3 = vector.broadcast %2 : i32 to vector<8x128xi32>
    %4 = arith.remsi %0, %3 : vector<8x128xi32>
    %c0_i32_0 = arith.constant 0 : i32
    %5 = vector.broadcast %c0_i32_0 : i32 to vector<8x128xi32>
    %6 = arith.cmpi ne, %4, %5 : vector<8x128xi32>
    %c0_i32_1 = arith.constant 0 : i32
    %7 = vector.broadcast %c0_i32_1 : i32 to vector<8x128xi32>
    %8 = arith.cmpi slt, %4, %7 : vector<8x128xi32>
    %c0_i32_2 = arith.constant 0 : i32
    %9 = arith.cmpi slt, %2, %c0_i32_2 : i32
    %10 = vector.broadcast %9 : i1 to vector<8x128xi1>
    %11 = vector.broadcast %10 : vector<8x128xi1> to vector<8x128xi1>
    %12 = arith.xori %8, %11 : vector<8x128xi1>
    %13 = arith.andi %12, %6 : vector<8x128xi1>
    %14 = vector.broadcast %2 : i32 to vector<8x128xi32>
    %15 = arith.addi %4, %14 : vector<8x128xi32>
    %16 = arith.select %13, %15, %4 : vector<8x128xi1>, vector<8x128xi32>
    %c15_i32 = arith.constant 15 : i32
    %17 = vector.broadcast %c15_i32 : i32 to vector<8x128xi32>
    %18 = arith.cmpi ne, %16, %17 : vector<8x128xi32>
    %19 = arith.extui %18 : vector<8x128xi1> to vector<8x128xi32>
    %20 = arith.sitofp %19 : vector<8x128xi32> to vector<8x128xf32>
    %c0_i32_3 = arith.constant 0 : i32
    %21 = vector.broadcast %c0_i32_3 : i32 to vector<8x128xi32>
    %22 = arith.cmpi ne, %16, %21 : vector<8x128xi32>
    %23 = arith.extui %22 : vector<8x128xi1> to vector<8x128xi32>
    %24 = arith.sitofp %23 : vector<8x128xi32> to vector<8x128xf32>
    %c0 = arith.constant 0 : index
    %c0_4 = arith.constant 0 : index
    %c0_5 = arith.constant 0 : index
    %25 = vector.load %arg2[%c0, %c0_4, %c0_5] : memref<2x24x8xf32, #tpu.memory_space<vmem>>, vector<1x24x8xf32>
    %26 = vector.shape_cast %25 : vector<1x24x8xf32> to vector<24x8xf32>
    %c1 = arith.constant 1 : index
    %c0_6 = arith.constant 0 : index
    %c0_7 = arith.constant 0 : index
    %27 = vector.load %arg2[%c1, %c0_6, %c0_7] : memref<2x24x8xf32, #tpu.memory_space<vmem>>, vector<1x24x8xf32>
    %28 = vector.shape_cast %27 : vector<1x24x8xf32> to vector<24x8xf32>
    %c0_8 = arith.constant 0 : index
    %c0_9 = arith.constant 0 : index
    %c0_10 = arith.constant 0 : index
    %29 = vector.load %arg1[%c0_8, %c0_9, %c0_10] : memref<1x8x128xf32, #tpu.memory_space<vmem>>, vector<1x8x128xf32>
    %30 = vector.shape_cast %29 : vector<1x8x128xf32> to vector<8x128xf32>
    %cst = arith.constant dense<0.000000e+00> : vector<24x128xf32>
    %31 = tpu.matmul %26, %30, %cst {dimension_numbers = #tpu.dot_dimension_numbers<[1], [0], [0], [1], [0, 0, 1, 1], [], []>} : vector<24x8xf32>, vector<8x128xf32>, vector<24x128xf32> -> vector<24x128xf32>
    %32 = vector.extract_strided_slice %31 {offsets = [8, 0], sizes = [8, 128], strides = [1, 1]} : vector<24x128xf32> to vector<8x128xf32>
    %33 = vector.extract_strided_slice %31 {offsets = [0, 0], sizes = [8, 128], strides = [1, 1]} : vector<24x128xf32> to vector<8x128xf32>
    %c127_i32 = arith.constant 127 : i32
    %34 = tpu.dynamic_rotate %33 by %c127_i32 dim 1 : vector<8x128xf32>, i32 -> vector<8x128xf32>
    %35 = arith.mulf %34, %20 : vector<8x128xf32>
    %36 = arith.addf %32, %35 : vector<8x128xf32>
    %37 = vector.extract_strided_slice %31 {offsets = [16, 0], sizes = [8, 128], strides = [1, 1]} : vector<24x128xf32> to vector<8x128xf32>
    %c1_i32_11 = arith.constant 1 : i32
    %38 = tpu.dynamic_rotate %37 by %c1_i32_11 dim 1 : vector<8x128xf32>, i32 -> vector<8x128xf32>
    %39 = arith.mulf %38, %24 : vector<8x128xf32>
    %40 = arith.addf %36, %39 : vector<8x128xf32>
    %cst_12 = arith.constant 0.000000e+00 : f32
    %41 = vector.broadcast %cst_12 : f32 to vector<8x128xf32>
    %42 = arith.maximumf %40, %41 : vector<8x128xf32>
    %cst_13 = arith.constant dense<0.000000e+00> : vector<24x128xf32>
    %43 = tpu.matmul %28, %42, %cst_13 {dimension_numbers = #tpu.dot_dimension_numbers<[1], [0], [0], [1], [0, 0, 1, 1], [], []>} : vector<24x8xf32>, vector<8x128xf32>, vector<24x128xf32> -> vector<24x128xf32>
    %44 = vector.extract_strided_slice %43 {offsets = [8, 0], sizes = [8, 128], strides = [1, 1]} : vector<24x128xf32> to vector<8x128xf32>
    %45 = vector.extract_strided_slice %43 {offsets = [0, 0], sizes = [8, 128], strides = [1, 1]} : vector<24x128xf32> to vector<8x128xf32>
    %c127_i32_14 = arith.constant 127 : i32
    %46 = tpu.dynamic_rotate %45 by %c127_i32_14 dim 1 : vector<8x128xf32>, i32 -> vector<8x128xf32>
    %47 = arith.mulf %46, %20 : vector<8x128xf32>
    %48 = arith.addf %44, %47 : vector<8x128xf32>
    %49 = vector.extract_strided_slice %43 {offsets = [16, 0], sizes = [8, 128], strides = [1, 1]} : vector<24x128xf32> to vector<8x128xf32>
    %c1_i32_15 = arith.constant 1 : i32
    %50 = tpu.dynamic_rotate %49 by %c1_i32_15 dim 1 : vector<8x128xf32>, i32 -> vector<8x128xf32>
    %51 = arith.mulf %50, %24 : vector<8x128xf32>
    %52 = arith.addf %48, %51 : vector<8x128xf32>
    %cst_16 = arith.constant 0.000000e+00 : f32
    %53 = vector.broadcast %cst_16 : f32 to vector<8x128xf32>
    %54 = arith.maximumf %52, %53 : vector<8x128xf32>
    %55 = arith.addf %54, %30 : vector<8x128xf32>
    %cst_17 = arith.constant 0.000000e+00 : f32
    %56 = vector.broadcast %cst_17 : f32 to vector<8x128xf32>
    %57 = arith.maximumf %55, %56 : vector<8x128xf32>
    %c0_18 = arith.constant 0 : index
    %c0_19 = arith.constant 0 : index
    %c0_20 = arith.constant 0 : index
    %58 = vector.load %arg3[%c0_18, %c0_19, %c0_20] : memref<1x8x128xf32, #tpu.memory_space<vmem>>, vector<1x8x128xf32>
    %59 = vector.shape_cast %58 : vector<1x8x128xf32> to vector<8x128xf32>
    %60 = vector.shape_cast %57 : vector<8x128xf32> to vector<1x8x128xf32>
    tpu.vector_store %arg3[%c0_18, %c0_19, %c0_20], %60 {strides = array<i32>} : memref<1x8x128xf32, #tpu.memory_space<vmem>>, vector<1x8x128xf32>,
    return
  }
  func.func @transform_0(%arg0: i32) -> (i32, i32, i32) {
    %c0_i32 = arith.constant 0 : i32
    %c0_i32_0 = arith.constant 0 : i32
    %c0_i32_1 = arith.constant 0 : i32
    return %arg0, %c0_i32, %c0_i32_0 : i32, i32, i32
  }
  func.func @transform_1(%arg0: i32) -> (i32, i32, i32) {
    %c0_i32 = arith.constant 0 : i32
    %c0_i32_0 = arith.constant 0 : i32
    %c0_i32_1 = arith.constant 0 : i32
    %c0_i32_2 = arith.constant 0 : i32
    return %c0_i32, %c0_i32_0, %c0_i32_1 : i32, i32, i32
  }
  func.func @transform_2(%arg0: i32) -> (i32, i32, i32) {
    %c0_i32 = arith.constant 0 : i32
    %c0_i32_0 = arith.constant 0 : i32
    %c0_i32_1 = arith.constant 0 : i32
    return %arg0, %c0_i32, %c0_i32_0 : i32, i32, i32
  }
}

</mosaic_0001>

<bundles_post_ra>
// kernel: tpu_custom_call.1
= control target key start
LH: loop header
LB: loop body
LE: loop exit
PB: predicated region body
PF: predicated region fallthrough
CT: control target
= control target key end

     0   :  { %vm40_vm0 = vcmask 64512   ;;  %v324_v2 = vmov 0.0   ;;  %vm325_vm1 = vmmov 0   ;;  %s397_s0 = inlined_call_operand.vmem [shape: f32[1,8,128], index: 0, kind: input, shape index: {}]   ;;  %s398_s1 = inlined_call_operand.vmem [shape: f32[2,24,8], index: 1, kind: input, shape index: {}]   ;;  %s399_s2 = inlined_call_operand.hbm [shape: f32[1,8,128], index: 2, kind: output, shape index: {}]  }
   0x1   :  { %v347_v0 = vld [vmem:[%s397_s0] sm:$0xff]  ;;  %273 = vmatprep.subr.mxu0 %v324_v2  ;;  %275 = vmatprep.mubr.msk.f32.mxu0 %vm325_vm1, %v324_v2 }
   0x2   :  { %v32_v1 = vld [vmem:[%s398_s1] sm:$0xff] }
   0x3   :  { %7 = vsyncpa [#allocation3], 0  ;;  %274 = vmatpush3.msra.mxu0 %v347_v0  ;;  %284 = vmatprep.subr.mxu1 %v324_v2  ;;  %v33_v3 = vld [vmem:[%s398_s1 + $0x8] sm:$0xff]  ;;  %v34_v4 = vld [vmem:[%s398_s1 + $0x10] sm:$0xff]  ;;  %s326_s16 = smov 127   ;;  %s327_s17 = smov 1   ;;  %v12_v11 = vlaneseq }
   0x4   :  { %276 = vmatmul.mubr.msk.f32.vlgmr.msra.gmra.mrb[0].mxu0 %vm40_vm0, %v32_v1  ;;  %286 = vmatprep.mubr.msk.f32.mxu1 %vm325_vm1, %v324_v2  ;;  %v256_v23 = vld [vmem:[%s398_s1 + $0x18] sm:$0xff]  ;;  %v257_v24 = vld [vmem:[%s398_s1 + $0x20] sm:$0xff]  ;;  %v258_v25 = vld [vmem:[%s398_s1 + $0x28] sm:$0xff]  ;;  %s328_s1 = smov [#allocation2]  }
   0x5   :  { %278 = vmatprep.mubr.msk.f32.mxu0 %vm325_vm1, %v324_v2  ;;  %v13_v12 = vand.u32 127, %v12_v11  ;;  %s246_s24 = sshll.u32 %s328_s1, 4  ;;  %s247_s24 = int_to_ptr.vmem [resolvable:$true] %s246_s24 }
   0x6   :  { %s300_s25 = scalar_lea.vmem %s247_s24, 128  ;;  %p305_p1 = scmp.lt.s32.totalorder %s247_s24, %s247_s24 }
   0x7   :  { %v18_v13 = vand.u32 15, %v13_v12  ;;  %p301_p0 = scmp.ne.s32.totalorder %s247_s24, %s300_s25  ;;  %p306_p2 = scmp.lt.s32.totalorder %s300_s25, %s300_s25 }
   0x8   :  { %279 = vmatmul.mubr.msk.f32.gmra.mrb[2].mxu0 %vm40_vm0, %v33_v3 }
   0x9   :  { %281 = vmatprep.mubr.msk.f32.mxu0 %vm325_vm1, %v324_v2  ;;  %vm26_vm2 = vcmp.ne.s32.totalorder %v18_v13, 15  ;;  %vm29_vm3 = vcmp.ne.s32.totalorder %v18_v13, 0  ;;  %p307_p3 = por %p306_p2, %p305_p1 }
   0xa   :  { %v254_v15 = vsel %vm26_vm2, 1.0, %v324_v2  ;;  %v255_v17 = vsel %vm29_vm3, 1.0, %v324_v2 }
   0xb   :  { %p308_p4 = pnand %p307_p3, %p301_p0 }
   0xc   :  { %282 = vmatmul.mubr.msk.f32.gmra.mrb[4].mxu0 %vm40_vm0, %v34_v4 }
  0xd7   :  { %v116_v5 = vpop.f32.mrb[0].mxu0 }
  0xd8   :  { %130 = vrot.lane.b32.xlu0 %v116_v5, %s326_s16  ;;  %v277_v6 = vpop.f32.mrb[1].mxu0 }
  0xdb   :  { %v121_v7 = vpop.f32.mrb[2].mxu0 }
  0xdc   :  { %v280_v8 = vpop.f32.mrb[3].mxu0 }
  0xdf   :  { %v126_v9 = vpop.f32.mrb[4].mxu0 }
  0xe0   :  { %134 = vrot.lane.b32.xlu0 %v126_v9, %s327_s17  ;;  %v283_v10 = vpop.f32.mrb[5].mxu0 }
 0x14a   :  { %v131_v14 = vpop.permute.xlu0 %130 }
 0x14b   :  { %v132_v16 = vmul.f32 %v254_v15, %v131_v14 }
 0x14d   :  { %v133_v19 = vadd.f32 %v132_v16, %v121_v7 }
 0x152   :  { %v135_v18 = vpop.permute.xlu0 %134 }
 0x153   :  { %v136_v20 = vmul.f32 %v255_v17, %v135_v18 }
 0x155   :  { %v137_v21 = vadd.f32 %v136_v20, %v133_v19 }
 0x157   :  { %v138_v22 = vmax.f32 %v137_v21, 0.0 }
 0x159   :  { %285 = vmatpush3.msra.mxu1 %v138_v22 }
 0x15a   :  { %287 = vmatmul.mubr.msk.f32.vlgmr.msra.gmra.mrb[0].mxu1 %vm40_vm0, %v256_v23 }
 0x15b   :  { %289 = vmatprep.mubr.msk.f32.mxu1 %vm325_vm1, %v324_v2 }
 0x15e   :  { %290 = vmatmul.mubr.msk.f32.gmra.mrb[2].mxu1 %vm40_vm0, %v257_v24 }
 0x15f   :  { %292 = vmatprep.mubr.msk.f32.mxu1 %vm325_vm1, %v324_v2 }
 0x162   :  { %293 = vmatmul.mubr.msk.f32.gmra.mrb[4].mxu1 %vm40_vm0, %v258_v25 }
 0x22d   :  { %v214_v26 = vpop.f32.mrb[0].mxu1 }
 0x22e   :  { %228 = vrot.lane.b32.xlu1 %v214_v26, %s326_s16  ;;  %v288_v27 = vpop.f32.mrb[1].mxu1 }
 0x231   :  { %v219_v28 = vpop.f32.mrb[2].mxu1 }
 0x232   :  { %v291_v29 = vpop.f32.mrb[3].mxu1 }
 0x235   :  { %v224_v30 = vpop.f32.mrb[4].mxu1 }
 0x236   :  { %232 = vrot.lane.b32.xlu1 %v224_v30, %s327_s17  ;;  %v294_v31 = vpop.f32.mrb[5].mxu1 }
 0x2a0   :  { %v229_v32 = vpop.permute.xlu1 %228 }
 0x2a1   :  { %v230_v33 = vmul.f32 %v254_v15, %v229_v32 }
 0x2a3   :  { %v231_v35 = vadd.f32 %v230_v33, %v219_v28 }
 0x2a8   :  { %v233_v34 = vpop.permute.xlu1 %232 }
 0x2a9   :  { %v234_v36 = vmul.f32 %v255_v17, %v233_v34 }
 0x2ab   :  { %v235_v37 = vadd.f32 %v234_v36, %v231_v35 }
 0x2ad   :  { %v236_v38 = vmax.f32 %v235_v37, 0.0 }
 0x2af   :  { %v237_v39 = vadd.f32 %v236_v38, %v347_v0 }
 0x2b1   :  { %v238_v40 = vmax.f32 %v237_v39, 0.0 }
 0x2b3   :  { %239 = vst [vmem:[#allocation2] sm:$0xff] %v238_v40 }
 0x2b4   :  { %311 = shalt.err (!%p308_p4)
}
 0x2b5   :  { %s312_s28 = scalar_lea.hbm %s399_s2, 128 }
 0x2b6   :  { %p313_p5 = scmp.ne.s32.totalorder %s399_s2, %s312_s28  ;;  %p316_p6 = scmp.lt.u32.totalorder %s312_s28, %s399_s2 }
 0x2b8   :  { %p318_p7 = pnand %p316_p6, %p313_p5 }
 0x2ba   :  { %321 = shalt.err (!%p318_p7)
}
 0x2bb   :  { %249 = dma.vmem_to_hbm [thread:$0]  %s247_s24, 128, %s399_s2, [#allocation3]  }
 0x2bc   :  { %322 = dma.done.wait [#allocation3], 128  }
 0x2bd   :  { %323 = vsyncadd [#allocation3], 4294967168 }
 0x2be   :  { %253 = vsyncpa [#allocation3], 1 }

</bundles_post_ra>
